<compile_context>
chip_gen: v7x
topology: tpu7x:2x2x1
jax: 0.10.0
libtpu: 0.0.40
codegen_flags: <defaults>
</compile_context>

<pallas_src>
import functools

import jax
import jax.numpy as jnp
from jax.experimental import pallas as pl
from jax.experimental.pallas import tpu as pltpu


def _round_up(n: int, m: int) -> int:
    return ((n + m - 1) // m) * m


def _pad2d(x, rows, cols, dtype):
    r, c = x.shape
    return jnp.pad(x, ((0, rows - r), (0, cols - c))).astype(dtype)


def _full_spec(shape):
    # whole-array block (no grid) => no (8,128) divisibility requirement
    return pl.BlockSpec(shape, lambda *_: (0,) * len(shape))


# ----------------------------------------------------------------------------
# Pallas kernels
# ----------------------------------------------------------------------------
def _fused_sage2_kernel(a_ref, inv_ref, x_ref, w1_ref, b1_ref, w2_ref, b2_ref,
                        o_ref, h1_ref, *, tm):
    """Two fused GraphSAGE (mean-agg) layers over a (phase, row_tile) grid.

    phase 0:  h1[tile] = relu([x_tile | inv*(A_tile @ x)] @ [[W1s],[W1n]] + b1)
    phase 1:  out[tile] =      [h1_tile | inv*(A_tile @ h1)] @ [[W2s],[W2n]] + b2

    A row tiles are streamed (double-buffered) by BlockSpec; x and the weights
    stay resident; h1 lives in a persistent bf16 VMEM scratch across the grid.
    All MXU operands are bf16 with f32 accumulation; the fused [self|neigh]
    matmul has K = 2*128 = 256 (fills the v6e/v7x MXU).
    """
    f32, bf16 = jnp.float32, jnp.bfloat16
    phase = pl.program_id(0)
    i = pl.program_id(1)
    row0 = pl.multiple_of(i * tm, tm)

    a = a_ref[...]        # (TM, N_p)  bf16 raw neighbor counts (unnormalized)
    inv = inv_ref[...]    # (TM, 1)    f32  1/deg for these rows

    @pl.when(phase == 0)
    def _layer1():
        x_all = x_ref[...]                                  # (N_p, F_p) bf16
        x_tile = x_ref[pl.ds(row0, tm), :]                  # (TM, F_p)  bf16
        agg = jnp.dot(a, x_all, preferred_element_type=f32) * inv
        cat = jnp.concatenate([x_tile, agg.astype(bf16)], axis=-1)
        h = jnp.dot(cat, w1_ref[...], preferred_element_type=f32) + b1_ref[...]
        h1_ref[pl.ds(row0, tm), :] = jnp.maximum(h, 0.0).astype(bf16)

    @pl.when(phase == 1)
    def _layer2():
        h_all = h1_ref[...]                                 # (N_p, H_p) bf16
        h_tile = h1_ref[pl.ds(row0, tm), :]                 # (TM, H_p)  bf16
        agg = jnp.dot(a, h_all, preferred_element_type=f32) * inv
        cat = jnp.concatenate([h_tile, agg.astype(bf16)], axis=-1)
        out = jnp.dot(cat, w2_ref[...], preferred_element_type=f32) + b2_ref[...]
        o_ref[...] = out.astype(o_ref.dtype)


def _decode_kernel(q_ref, ct_ref, o_ref):
    """Inner-product decoder: scores = Q @ C^T.
    Candidates arrive pre-transposed -> plain (M,K)x(K,N) MXU matmul,
    output lane-dense over candidates."""
    o_ref[...] = jnp.dot(q_ref[...], ct_ref[...],
                         preferred_element_type=jnp.float32)


# ----------------------------------------------------------------------------
# Wrappers
# ----------------------------------------------------------------------------
def _vmem_need_bytes(tm, n_p, f_p, h_p, o_p):
    return (2 * tm * n_p * 2                      # A row tile, 2-deep, bf16
            + 2 * tm * 4                          # inv-deg tile, 2-deep, f32
            + n_p * f_p * 2                       # x resident, bf16
            + n_p * h_p * 2                       # h1 scratch, bf16
            + 2 * tm * o_p * 4                    # out tile, 2-deep, f32
            + (2 * f_p * h_p + 2 * h_p * o_p) * 2 # stacked weights, bf16
            + (h_p + o_p) * 4)                    # bias rows, f32


def _pick_row_tile(n_p, f_p, h_p, o_p, budget=24 << 20):
    # Generation-aware: budget sized so the 2-deep pipeline stays resident even
    # on v7x (64 MiB physical / 32 MiB default scoped VMEM).
    for tm in (512, 256, 128):
        if n_p % tm == 0 and _vmem_need_bytes(tm, n_p, f_p, h_p, o_p) <= budget:
            return tm
    return 128  # n_p is always a multiple of 128


def fused_sage_forward(a01, inv_deg, x, kernel_params, out_dim):
    """a01: (N_p, N_p) bf16 unnormalized 0/1-count adjacency (zero padding);
       inv_deg: (N_p, 1) f32 per-row 1/deg; x: (N, F) node features."""
    n = x.shape[0]
    n_p = a01.shape[0]
    (w1, b1), (w2, b2) = kernel_params
    f_p, h_p = w1.shape[0] // 2, w1.shape[1]
    o_p = w2.shape[1]
    x_p = _pad2d(x, n_p, f_p, jnp.bfloat16)

    tm = _pick_row_tile(n_p, f_p, h_p, o_p)
    n_tiles = n_p // tm
    need = _vmem_need_bytes(tm, n_p, f_p, h_p, o_p)
    vmem_limit = int(max(min(need + (8 << 20), 56 << 20), 32 << 20))

    flops = (2 * n_p * n_p * (f_p + h_p)                     # aggregation
             + 2 * n_p * (2 * f_p * h_p + 2 * h_p * o_p))    # fused projections
    bytes_accessed = (2 * n_p * n_p * 2 + n_p * f_p * 2 + n_p * o_p * 4
                      + (2 * f_p * h_p + 2 * h_p * o_p) * 2 + n_p * 4)

    out_p = pl.pallas_call(
        functools.partial(_fused_sage2_kernel, tm=tm),
        out_shape=jax.ShapeDtypeStruct((n_p, o_p), jnp.float32),
        grid_spec=pltpu.PrefetchScalarGridSpec(
            num_scalar_prefetch=0,
            grid=(2, n_tiles),                                 # (phase, row tile)
            in_specs=[
                pl.BlockSpec((tm, n_p), lambda p, i: (i, 0)),   # A rows, streamed
                pl.BlockSpec((tm, 1), lambda p, i: (i, 0)),     # 1/deg rows
                pl.BlockSpec((n_p, f_p), lambda p, i: (0, 0)),  # x, resident
                pl.BlockSpec(w1.shape, lambda p, i: (0, 0)),
                pl.BlockSpec(b1.shape, lambda p, i: (0, 0)),
                pl.BlockSpec(w2.shape, lambda p, i: (0, 0)),
                pl.BlockSpec(b2.shape, lambda p, i: (0, 0)),
            ],
            # phase 0 never writes -> the block index is pinned to 0 so nothing
            # is flushed to HBM until phase 1 produces real row tiles.
            out_specs=pl.BlockSpec((tm, o_p), lambda p, i: (p * i, 0)),
            scratch_shapes=[pltpu.VMEM((n_p, h_p), jnp.bfloat16)],  # persistent h1
        ),
        compiler_params=pltpu.CompilerParams(
            # Cross-phase h1 dependence forbids "parallel" row sharding here.
            dimension_semantics=("arbitrary", "arbitrary"),
            vmem_limit_bytes=vmem_limit,
        ),
        cost_estimate=pl.CostEstimate(flops=flops, transcendentals=0,
                                      bytes_accessed=bytes_accessed),
    )(a01, inv_deg, x_p, w1, b1, w2, b2)
    return out_p[:n, :out_dim]


def decode_scores(query_embeddings, candidate_embeddings):
    nq, d = query_embeddings.shape
    nc = candidate_embeddings.shape[0]
    nq_p = _round_up(nq, 16)      # bf16 sublane packing
    nc_p = _round_up(nc, 128)     # lane-dense output over candidates
    d_p = _round_up(d, 128)       # full-width MXU contraction
    q_p = _pad2d(query_embeddings, nq_p, d_p, jnp.bfloat16)
    ct_p = _pad2d(candidate_embeddings.T, d_p, nc_p, jnp.bfloat16)  # one-time transpose

    out_p = pl.pallas_call(
        _decode_kernel,
        out_shape=jax.ShapeDtypeStruct((nq_p, nc_p), jnp.float32),
        in_specs=[_full_spec(q_p.shape), _full_spec(ct_p.shape)],
        out_specs=_full_spec((nq_p, nc_p)),
    )(q_p, ct_p)
    return out_p[:nq, :nc]


# ----------------------------------------------------------------------------
# LinkPredictionGNN equivalent (parameters + forward/decode)
# ----------------------------------------------------------------------------
class LinkPredictionGNN:
    """JAX/Pallas re-implementation of gigl LinkPredictionGNN with a
    2-layer GraphSAGE encoder and an inner-product decoder (homogeneous)."""

    def __init__(self, in_dim: int, hidden_dim: int, out_dim: int, key):
        dims = [(in_dim, hidden_dim), (hidden_dim, out_dim)]
        self.out_dim = out_dim
        self.params = []          # unpadded f32 (reference / export)
        self._kernel_params = []  # padded bf16 [W_self; W_neigh] stacks + f32 bias rows
        for d_in, d_out in dims:
            key, k1, k2, k3 = jax.random.split(key, 4)
            scale = 1.0 / jnp.sqrt(jnp.float32(d_in))
            # nn.Linear-style weights (out, in); transposed for the kernel.
            w_self = jax.random.uniform(k1, (d_out, d_in), jnp.float32, -scale, scale)
            w_neigh = jax.random.uniform(k2, (d_out, d_in), jnp.float32, -scale, scale)
            b = jax.random.uniform(k3, (d_out,), jnp.float32, -scale, scale)
            ws_t, wn_t, b_row = w_self.T, w_neigh.T, b.reshape(1, d_out)
            self.params.append((ws_t, wn_t, b_row))

            d_in_p, d_out_p = _round_up(d_in, 128), _round_up(d_out, 128)
            ws_p = _pad2d(ws_t, d_in_p, d_out_p, jnp.bfloat16)
            wn_p = _pad2d(wn_t, d_in_p, d_out_p, jnp.bfloat16)
            # Vertically stacked so [h | agg] @ W_stack fuses self + neighbor
            # projections into one K=2*d_in_p matmul.
            w_stack = jnp.concatenate([ws_p, wn_p], axis=0)
            b_p = _pad2d(b_row, 1, d_out_p, jnp.float32)
            self._kernel_params.append((w_stack, b_p))

    @staticmethod
    def _adjacency_and_invdeg(edge_index, num_nodes, n_pad):
        """One-pass padded bf16 0/1-count adjacency + O(E) inverse degrees.
        (A @ x) * inv_deg == mean_{j in N(i)} x[j]; padded rows/cols are zero."""
        src, dst = edge_index[0], edge_index[1]
        one_bf16 = jnp.ones((), jnp.bfloat16)
        a01 = jnp.zeros((n_pad, n_pad), jnp.bfloat16).at[dst, src].add(one_bf16)
        deg = jnp.zeros((n_pad,), jnp.float32).at[dst].add(1.0)
        inv = (1.0 / jnp.maximum(deg, 1.0)).reshape(n_pad, 1)
        return a01, inv

    def forward(self, data: dict, output_node_types: list, device=None):
        """data = {"x": (N, F) float32, "edge_index": (2, E) int32} (homogeneous)."""
        if len(output_node_types) > 1:
            raise NotImplementedError(
                f"Found {len(output_node_types)} output node types for homogeneous "
                "data, which must have one node type")
        x = data["x"]
        n = x.shape[0]
        n_p = _round_up(n, 128)
        a01, inv = self._adjacency_and_invdeg(data["edge_index"], n, n_p)
        h = fused_sage_forward(a01, inv, x, self._kernel_params, self.out_dim)
        return {output_node_types[0]: h}

    def decode(self, query_embeddings, candidate_embeddings):
        return decode_scores(query_embeddings, candidate_embeddings)


# ----------------------------------------------------------------------------
if __name__ == "__main__":
    key = jax.random.PRNGKey(0)
    k_feat, k_edge, k_model = jax.random.split(key, 3)

    NUM_NODES = 32
    IN_DIM = 16
    HIDDEN_DIM = 32
    OUT_DIM = 32
    NUM_EDGES = 96

    x = jax.random.normal(k_feat, (NUM_NODES, IN_DIM), jnp.float32)
    edge_index = jax.random.randint(k_edge, (2, NUM_EDGES), 0, NUM_NODES,
                                    dtype=jnp.int32)
    data = {"x": x, "edge_index": edge_index}

    model = LinkPredictionGNN(IN_DIM, HIDDEN_DIM, OUT_DIM, k_model)

    # forward(): {node_type: embeddings}
    out = model.forward(data, output_node_types=["user"])
    emb = jax.block_until_ready(out["user"])
    assert emb.shape == (NUM_NODES, OUT_DIM) and emb.dtype == jnp.float32

    # decode(): inner-product scores between query and candidate embeddings
    scores = model.decode(emb[:8], emb[8:24])
    scores = jax.block_until_ready(scores)
    assert scores.shape == (8, 16) and scores.dtype == jnp.float32

    # ---- pure-JAX reference mirroring the kernel's bf16/f32 math path ----
    def _q(t):  # bf16 quantization matching what the kernel's MXU sees
        return t.astype(jnp.bfloat16).astype(jnp.float32)

    def ref_forward(x, edge_index, model):
        n = x.shape[0]
        n_p = _round_up(n, 128)
        a01, inv = LinkPredictionGNN._adjacency_and_invdeg(edge_index, n, n_p)
        a = a01.astype(jnp.float32)
        f_p = _round_up(x.shape[1], 128)
        h = _pad2d(x, n_p, f_p, jnp.bfloat16).astype(jnp.float32)
        n_layers = len(model.params)
        for li, (ws, wn, b_row) in enumerate(model.params):
            d_in_p = _round_up(ws.shape[0], 128)
            d_out_p = _round_up(ws.shape[1], 128)
            ws_q = _pad2d(ws, d_in_p, d_out_p, jnp.bfloat16).astype(jnp.float32)
            wn_q = _pad2d(wn, d_in_p, d_out_p, jnp.bfloat16).astype(jnp.float32)
            b_p = _pad2d(b_row, 1, d_out_p, jnp.float32)
            agg = _q((a @ h) * inv)
            h_new = h @ ws_q + agg @ wn_q + b_p
            if li < n_layers - 1:
                h = _q(jnp.maximum(h_new, 0.0))   # bf16 h1 scratch in the kernel
            else:
                h = h_new
        return h[:n, :model.out_dim]

    ref = ref_forward(x, edge_index, model)
    assert jnp.allclose(ref, emb, atol=1e-2, rtol=1e-2)

    ref_scores = jnp.dot(emb[:8].astype(jnp.bfloat16),
                         emb[8:24].astype(jnp.bfloat16).T,
                         preferred_element_type=jnp.float32)
    assert jnp.allclose(ref_scores, scores, atol=1e-3, rtol=1e-3)

    print("KERNEL_OK")
</pallas_src>

<mosaic_0001>
module attributes {stable_mosaic.version = 11 : i64} {
  func.func @_fused_sage2_kernel(%arg0: i32, %arg1: i32, %arg2: memref<128x128xbf16, #tpu.memory_space<vmem>>, %arg3: memref<128x1xf32, #tpu.memory_space<vmem>>, %arg4: memref<128x128xbf16, #tpu.memory_space<vmem>>, %arg5: memref<256x128xbf16, #tpu.memory_space<vmem>>, %arg6: memref<1x128xf32, #tpu.memory_space<vmem>>, %arg7: memref<256x128xbf16, #tpu.memory_space<vmem>>, %arg8: memref<1x128xf32, #tpu.memory_space<vmem>>, %arg9: memref<128x128xf32, #tpu.memory_space<vmem>>, %arg10: memref<128x128xbf16, #tpu.memory_space<vmem>>) attributes {dimension_semantics = [#tpu.dimension_semantics<arbitrary>, #tpu.dimension_semantics<arbitrary>], iteration_bounds = array<i64: 2, 1>, scalar_prefetch = 0 : i64, scratch_operands = 1 : i64, tpu.core_type = #tpu.core_type<tc>, window_params = [{transform_indices = @transform_0, window_bounds = array<i64: 128, 128>}, {transform_indices = @transform_1, window_bounds = array<i64: 128, 1>}, {pipeline_mode = #tpu.pipeline_mode<synchronous>, transform_indices = @transform_2, window_bounds = array<i64: 128, 128>}, {pipeline_mode = #tpu.pipeline_mode<synchronous>, transform_indices = @transform_3, window_bounds = array<i64: 256, 128>}, {pipeline_mode = #tpu.pipeline_mode<synchronous>, transform_indices = @transform_4, window_bounds = array<i64: 1, 128>}, {pipeline_mode = #tpu.pipeline_mode<synchronous>, transform_indices = @transform_5, window_bounds = array<i64: 256, 128>}, {pipeline_mode = #tpu.pipeline_mode<synchronous>, transform_indices = @transform_6, window_bounds = array<i64: 1, 128>}, {transform_indices = @transform_7, window_bounds = array<i64: 128, 128>}]} {
    %c128_i32 = arith.constant 128 : i32
    %0 = arith.muli %arg1, %c128_i32 : i32
    %1 = tpu.assume_multiple %0, 128 : i32
    %c0 = arith.constant 0 : index
    %c0_0 = arith.constant 0 : index
    %2 = vector.load %arg2[%c0, %c0_0] : memref<128x128xbf16, #tpu.memory_space<vmem>>, vector<128x128xbf16>
    %c0_1 = arith.constant 0 : index
    %c0_2 = arith.constant 0 : index
    %3 = vector.load %arg3[%c0_1, %c0_2] : memref<128x1xf32, #tpu.memory_space<vmem>>, vector<128x1xf32>
    %c0_i32 = arith.constant 0 : i32
    %4 = arith.cmpi eq, %arg0, %c0_i32 : i32
    %5 = arith.extui %4 : i1 to i32
    %c0_i32_3 = arith.constant 0 : i32
    %6 = arith.cmpi ne, %5, %c0_i32_3 : i32
    scf.if %6 {
      %c0_5 = arith.constant 0 : index
      %c0_6 = arith.constant 0 : index
      %10 = vector.load %arg4[%c0_5, %c0_6] : memref<128x128xbf16, #tpu.memory_space<vmem>>, vector<128x128xbf16>
      %11 = arith.index_cast %1 : i32 to index
      %c0_7 = arith.constant 0 : index
      %12 = vector.load %arg4[%11, %c0_7] : memref<128x128xbf16, #tpu.memory_space<vmem>>, vector<128x128xbf16>
      %cst = arith.constant dense<0.000000e+00> : vector<128x128xf32>
      %13 = tpu.matmul %2, %10, %cst {dimension_numbers = #tpu.dot_dimension_numbers<[1], [0], [0], [1], [0, 0, 1, 1], [], []>} : vector<128x128xbf16>, vector<128x128xbf16>, vector<128x128xf32> -> vector<128x128xf32>
      %14 = vector.broadcast %3 : vector<128x1xf32> to vector<128x128xf32>
      %15 = arith.mulf %13, %14 : vector<128x128xf32>
      %16 = arith.truncf %15 : vector<128x128xf32> to vector<128x128xbf16>
      %17 = tpu.concatenate %12, %16 in 1 : vector<128x128xbf16>, vector<128x128xbf16> -> vector<128x256xbf16>
      %c0_8 = arith.constant 0 : index
      %c0_9 = arith.constant 0 : index
      %18 = vector.load %arg5[%c0_8, %c0_9] : memref<256x128xbf16, #tpu.memory_space<vmem>>, vector<256x128xbf16>
      %cst_10 = arith.constant dense<0.000000e+00> : vector<128x128xf32>
      %19 = tpu.matmul %17, %18, %cst_10 {dimension_numbers = #tpu.dot_dimension_numbers<[1], [0], [0], [1], [0, 0, 1, 1], [], []>} : vector<128x256xbf16>, vector<256x128xbf16>, vector<128x128xf32> -> vector<128x128xf32>
      %c0_11 = arith.constant 0 : index
      %c0_12 = arith.constant 0 : index
      %20 = vector.load %arg6[%c0_11, %c0_12] : memref<1x128xf32, #tpu.memory_space<vmem>>, vector<1x128xf32>
      %21 = vector.broadcast %20 : vector<1x128xf32> to vector<128x128xf32>
      %22 = arith.addf %19, %21 : vector<128x128xf32>
      %cst_13 = arith.constant 0.000000e+00 : f32
      %23 = vector.broadcast %cst_13 : f32 to vector<128x128xf32>
      %24 = arith.maximumf %22, %23 : vector<128x128xf32>
      %25 = arith.truncf %24 : vector<128x128xf32> to vector<128x128xbf16>
      %26 = arith.index_cast %1 : i32 to index
      %c0_14 = arith.constant 0 : index
      %27 = vector.load %arg10[%26, %c0_14] : memref<128x128xbf16, #tpu.memory_space<vmem>>, vector<128x128xbf16>
      tpu.vector_store %arg10[%26, %c0_14], %25 {strides = array<i32>} : memref<128x128xbf16, #tpu.memory_space<vmem>>, vector<128x128xbf16>,
    } else {
    }
    %c1_i32 = arith.constant 1 : i32
    %7 = arith.cmpi eq, %arg0, %c1_i32 : i32
    %8 = arith.extui %7 : i1 to i32
    %c0_i32_4 = arith.constant 0 : i32
    %9 = arith.cmpi ne, %8, %c0_i32_4 : i32
    scf.if %9 {
      %c0_5 = arith.constant 0 : index
      %c0_6 = arith.constant 0 : index
      %10 = vector.load %arg10[%c0_5, %c0_6] : memref<128x128xbf16, #tpu.memory_space<vmem>>, vector<128x128xbf16>
      %11 = arith.index_cast %1 : i32 to index
      %c0_7 = arith.constant 0 : index
      %12 = vector.load %arg10[%11, %c0_7] : memref<128x128xbf16, #tpu.memory_space<vmem>>, vector<128x128xbf16>
      %cst = arith.constant dense<0.000000e+00> : vector<128x128xf32>
      %13 = tpu.matmul %2, %10, %cst {dimension_numbers = #tpu.dot_dimension_numbers<[1], [0], [0], [1], [0, 0, 1, 1], [], []>} : vector<128x128xbf16>, vector<128x128xbf16>, vector<128x128xf32> -> vector<128x128xf32>
      %14 = vector.broadcast %3 : vector<128x1xf32> to vector<128x128xf32>
      %15 = arith.mulf %13, %14 : vector<128x128xf32>
      %16 = arith.truncf %15 : vector<128x128xf32> to vector<128x128xbf16>
      %17 = tpu.concatenate %12, %16 in 1 : vector<128x128xbf16>, vector<128x128xbf16> -> vector<128x256xbf16>
      %c0_8 = arith.constant 0 : index
      %c0_9 = arith.constant 0 : index
      %18 = vector.load %arg7[%c0_8, %c0_9] : memref<256x128xbf16, #tpu.memory_space<vmem>>, vector<256x128xbf16>
      %cst_10 = arith.constant dense<0.000000e+00> : vector<128x128xf32>
      %19 = tpu.matmul %17, %18, %cst_10 {dimension_numbers = #tpu.dot_dimension_numbers<[1], [0], [0], [1], [0, 0, 1, 1], [], []>} : vector<128x256xbf16>, vector<256x128xbf16>, vector<128x128xf32> -> vector<128x128xf32>
      %c0_11 = arith.constant 0 : index
      %c0_12 = arith.constant 0 : index
      %20 = vector.load %arg8[%c0_11, %c0_12] : memref<1x128xf32, #tpu.memory_space<vmem>>, vector<1x128xf32>
      %21 = vector.broadcast %20 : vector<1x128xf32> to vector<128x128xf32>
      %22 = arith.addf %19, %21 : vector<128x128xf32>
      %c0_13 = arith.constant 0 : index
      %c0_14 = arith.constant 0 : index
      %23 = vector.load %arg9[%c0_13, %c0_14] : memref<128x128xf32, #tpu.memory_space<vmem>>, vector<128x128xf32>
      tpu.vector_store %arg9[%c0_13, %c0_14], %22 {strides = array<i32>} : memref<128x128xf32, #tpu.memory_space<vmem>>, vector<128x128xf32>,
    } else {
    }
    return
  }
  func.func @transform_0(%arg0: i32, %arg1: i32) -> (i32, i32) {
    %c0_i32 = arith.constant 0 : i32
    %c0_i32_0 = arith.constant 0 : i32
    return %arg1, %c0_i32 : i32, i32
  }
  func.func @transform_1(%arg0: i32, %arg1: i32) -> (i32, i32) {
    %c0_i32 = arith.constant 0 : i32
    %c0_i32_0 = arith.constant 0 : i32
    return %arg1, %c0_i32 : i32, i32
  }
  func.func @transform_2(%arg0: i32, %arg1: i32) -> (i32, i32) {
    %c0_i32 = arith.constant 0 : i32
    %c0_i32_0 = arith.constant 0 : i32
    %c0_i32_1 = arith.constant 0 : i32
    return %c0_i32, %c0_i32_0 : i32, i32
  }
  func.func @transform_3(%arg0: i32, %arg1: i32) -> (i32, i32) {
    %c0_i32 = arith.constant 0 : i32
    %c0_i32_0 = arith.constant 0 : i32
    %c0_i32_1 = arith.constant 0 : i32
    return %c0_i32, %c0_i32_0 : i32, i32
  }
  func.func @transform_4(%arg0: i32, %arg1: i32) -> (i32, i32) {
    %c0_i32 = arith.constant 0 : i32
    %c0_i32_0 = arith.constant 0 : i32
    %c0_i32_1 = arith.constant 0 : i32
    return %c0_i32, %c0_i32_0 : i32, i32
  }
  func.func @transform_5(%arg0: i32, %arg1: i32) -> (i32, i32) {
    %c0_i32 = arith.constant 0 : i32
    %c0_i32_0 = arith.constant 0 : i32
    %c0_i32_1 = arith.constant 0 : i32
    return %c0_i32, %c0_i32_0 : i32, i32
  }
  func.func @transform_6(%arg0: i32, %arg1: i32) -> (i32, i32) {
    %c0_i32 = arith.constant 0 : i32
    %c0_i32_0 = arith.constant 0 : i32
    %c0_i32_1 = arith.constant 0 : i32
    return %c0_i32, %c0_i32_0 : i32, i32
  }
  func.func @transform_7(%arg0: i32, %arg1: i32) -> (i32, i32) {
    %0 = arith.muli %arg0, %arg1 : i32
    %c0_i32 = arith.constant 0 : i32
    %c0_i32_0 = arith.constant 0 : i32
    return %0, %c0_i32 : i32, i32
  }
}

</mosaic_0001>

<bundles_post_ra>
// kernel: tpu_custom_call.1
= control target key start
LH: loop header
LB: loop body
LE: loop exit
PB: predicated region body
PF: predicated region fallthrough
CT: control target
= control target key end

     0   :  { %12 = vsyncpa [#allocation4], 0  ;;  %s2812_s0 = inlined_call_operand.hbm [shape: bf16[128,128], index: 0, kind: input, shape index: {}]   ;;  %s2813_s1 = inlined_call_operand.vmem [shape: f32[128,1], index: 1, kind: input, shape index: {}]   ;;  %s2814_s2 = inlined_call_operand.hbm [shape: bf16[128,128], index: 2, kind: input, shape index: {}]   ;;  %s2815_s3 = inlined_call_operand.vmem [shape: bf16[256,128], index: 3, kind: input, shape index: {}]   ;;  %s2816_s4 = inlined_call_operand.vmem [shape: f32[1,128], index: 4, kind: input, shape index: {}]   ;;  %s2817_s5 = inlined_call_operand.hbm [shape: bf16[256,128], index: 5, kind: input, shape index: {}]   ;;  %s2818_s6 = inlined_call_operand.vmem [shape: f32[1,128], index: 6, kind: input, shape index: {}]   ;;  %s2819_s7 = inlined_call_operand.hbm [shape: f32[128,128], index: 7, kind: output, shape index: {}]  }
   0x1   :  { %13 = vsyncpa [#allocation7], 0 }
   0x2   :  { %14 = vsyncpa [#allocation5], 0 }
   0x3   :  { %16 = vsyncpa [#allocation5 + $0x1], 0  ;;  %s2343_s24 = smov 0   ;;  %s2345_s25 = smov 0  }
   0x4   :  { %s2347_s26 = smov 0  }
   0x5 LB: > { %s2823_s27 = sadd.s32 4294967295, %s2291_s26   ;;  %p1685_p0 = scmp.ge.s32.totalorder %s2291_s26, 1  ;;  %s2291_s26 = sphi %s2347_s26, %s22_s26   ;;  %s2287_s25 = sphi %s2345_s25, %s2842_s25   ;;  %s2283_s24 = sphi %s2343_s24, %s2841_s24  }
   0x6   : > { %p224_p1 = scmp.lt.s32.totalorder %s2291_s26, 3  ;;  %p2364_p2 = scmp.eq.s32.totalorder %s2823_s27, 0 }
   0x7   : > { %s2293_s8 = smov [#allocation6]   ;;  %s34_s11 = sadd.s32 1, %s2287_s25 }
   0x8   : > { %s2826_s29 = scalar_select %p2364_p2, 1, 0 }
   0x9   : > { %p2368_p3 = pnand %p1685_p0, %p224_p1  ;;  %s261_s9 = sshll.u32 %s2293_s8, 4  ;;  %s262_s9 = int_to_ptr.vmem [resolvable:$true] %s261_s9 }
   0xa   : > { %p2381_p6 = scmp.ge.s32.totalorder %s34_s11, 2  ;;  %s2147_s15 = scalar_lea.hbm %s2814_s2, 1024 }
   0xb   : > { %s2827_s30 = scalar_select %p2368_p3, 1, 0 }
   0xc   : > { %p2038_p4 = pneg %p2368_p3  ;;  %p2148_p7 = scmp.ne.s32.totalorder %s2814_s2, %s2147_s15 }
   0xd   : > { %s2829_s12 = scalar_select %p2381_p6, 1, 0 }
   0xe   : > { %p2376_p5 = pnand %p2364_p2, %p2038_p4  ;;  %p2154_p11 = scmp.lt.u32.totalorder %s2147_s15, %s2814_s2 }
  0x10   : > { %p2393_p8 = pneg %p2376_p5 }
  0x12   : > { %p2150_p9 = pnand %p2393_p8, %p2148_p7 }
  0x14   : > { %p2151_p10 = pneg %p2150_p9 }
  0x16   : > { %p2156_p12 = pnand %p2154_p11, %p2151_p10 }
  0x18   : > { %2159 = shalt.err (!%p2156_p12)
}
  0x19   : > { %s2160_s21 = scalar_lea.vmem %s262_s9, 1024  ;;  %p2168_p4 = scmp.lt.s32.totalorder %s262_s9, %s262_s9 }
  0x1a   : > { %p2161_p13 = scmp.ne.s32.totalorder %s262_s9, %s2160_s21  ;;  %p2169_p2 = scmp.lt.s32.totalorder %s2160_s21, %s2160_s21 }
  0x1c   : > { %p2163_p0 = pnand %p2161_p13, %p2393_p8  ;;  %p2170_p3 = por %p2169_p2, %p2168_p4 }
  0x1e   : > { %p2164_p1 = pneg %p2163_p0 }
  0x20   : > { %p2171_p6 = pnand %p2170_p3, %p2164_p1 }
  0x22   : > { %2174 = shalt.err (!%p2171_p6)
}
  0x23   : > { %s2294_s22 = smov 64   ;;  %s2295_s23 = smov 4  }
  0x24   : > { %2044 = dma.hbm_to_vmem [thread:$0]  (!%p2376_p5), %s2814_s2, 1024, %s262_s9, [#allocation7], %s2294_s22, %s2294_s22, %s2295_s23  }
  0x25   : > { %p2831_p7 = scmp.ne.s32.totalorder %s2829_s12, 0  ;;  %s2296_s14 = smov [#allocation3]  }
  0x26   : > { %s239_s15 = sshll.u32 %s2296_s14, 4  ;;  %s2297_s16 = smov [#allocation8]   ;;  %s240_s15 = int_to_ptr.vmem [resolvable:$true] %s239_s15 }
  0x27   : > { %s2844_s11 = smov (%p2831_p7, %s34_s11), 0  ;;  %s280_s17 = sshll.u32 %s2297_s16, 4  ;;  %s281_s17 = int_to_ptr.vmem [resolvable:$true] %s280_s17 }
  0x28   : > { %s2175_s21 = scalar_lea.hbm %s2812_s0, 1024 }
  0x29   : > { %p2176_p2 = scmp.ne.s32.totalorder %s2812_s0, %s2175_s21  ;;  %p2182_p9 = scmp.lt.u32.totalorder %s2175_s21, %s2812_s0 }
  0x2b   : > { %p2178_p3 = pnand %p2176_p2, %p2393_p8 }
  0x2d   : > { %p2179_p6 = pneg %p2178_p3 }
  0x2f   : > { %p2184_p10 = pnand %p2182_p9, %p2179_p6 }
  0x31   : > { %2187 = shalt.err (!%p2184_p10)
}
  0x32   : > { %s2188_s8 = scalar_lea.vmem %s240_s15, 1024  ;;  %p2196_p0 = scmp.lt.s32.totalorder %s240_s15, %s240_s15 }
  0x33   : > { %p2189_p11 = scmp.ne.s32.totalorder %s240_s15, %s2188_s8  ;;  %p2197_p1 = scmp.lt.s32.totalorder %s2188_s8, %s2188_s8 }
  0x35   : > { %p2191_p12 = pnand %p2189_p11, %p2393_p8  ;;  %p2198_p4 = por %p2197_p1, %p2196_p0 }
  0x37   : > { %p2192_p13 = pneg %p2191_p12 }
  0x39   : > { %p2199_p7 = pnand %p2198_p4, %p2192_p13 }
  0x3b   : > { %2202 = shalt.err (!%p2199_p7)
}
  0x3c   : > { %2041 = dma.hbm_to_vmem [thread:$0]  (!%p2376_p5), %s2812_s0, 1024, %s240_s15, [#allocation4], %s2294_s22, %s2294_s22, %s2295_s23  }
  0x3d   : > { %s2203_s16 = scalar_lea.hbm %s2817_s5, 2048 }
  0x3e   : > { %p2204_p2 = scmp.ne.s32.totalorder %s2817_s5, %s2203_s16  ;;  %p2210_p9 = scmp.lt.u32.totalorder %s2203_s16, %s2817_s5 }
  0x40   : > { %p2206_p3 = pnand %p2204_p2, %p2393_p8 }
  0x42   : > { %p2207_p6 = pneg %p2206_p3 }
  0x44   : > { %p2212_p10 = pnand %p2210_p9, %p2207_p6 }
  0x46   : > { %2215 = shalt.err (!%p2212_p10)
}
  0x47   : > { %s2216_s12 = scalar_lea.vmem %s281_s17, 2048  ;;  %p2224_p0 = scmp.lt.s32.totalorder %s281_s17, %s281_s17 }
  0x48   : > { %p2217_p11 = scmp.ne.s32.totalorder %s281_s17, %s2216_s12  ;;  %p2225_p1 = scmp.lt.s32.totalorder %s2216_s12, %s2216_s12 }
  0x4a   : > { %p2219_p12 = pnand %p2217_p11, %p2393_p8  ;;  %p2226_p4 = por %p2225_p1, %p2224_p0 }
  0x4c   : > { %p2220_p13 = pneg %p2219_p12 }
  0x4e   : > { %p2227_p7 = pnand %p2226_p4, %p2220_p13 }
  0x50   : > { %2230 = shalt.err (!%p2227_p7)
}
  0x51   : > { %2047 = dma.hbm_to_vmem [thread:$0]  (!%p2376_p5), %s2817_s5, 2048, %s281_s17, [#allocation7], %s2294_s22, %s2294_s22, %s2295_s23  }
  0x52   : > { %p2832_p2 = scmp.ne.s32.totalorder %s2827_s30, 0 }
  0x54   : > { %299 = sbr.rel (%p2832_p2) target bundleno = 1178 (0x49a), region = 48 }
  0x5b   : > { %p2833_p8 = scmp.ne.s32.totalorder %s2826_s29, 0 }
  0x5d   : > { %2270 = dma.done.wait (%p2833_p8), [#allocation4], 1024  }
  0x5e   : > { %2272 = vsyncadd (%p2833_p8), [#allocation4], 4294966272 }
  0x5f   : > { %2274 = dma.done.wait (%p2833_p8), [#allocation7], 3072  }
  0x60   : > { %2276 = vsyncadd (%p2833_p8), [#allocation7], 4294964224  ;;  %v2468_v0 = vld [vmem:[#allocation3] sm:$0xf]  ;;  %v2470_v1 = vld [vmem:[#allocation3 + $0x4] sm:$0xf] }
  0x61   : > { %v2472_v2 = vld [vmem:[#allocation3 + $0x8] sm:$0xf]  ;;  %v2474_v3 = vld [vmem:[#allocation3 + $0xc] sm:$0xf]  ;;  %v2476_v4 = vld [vmem:[#allocation3 + $0x10] sm:$0xf] }
  0x62   : > { %v2478_v5 = vld [vmem:[#allocation3 + $0x14] sm:$0xf]  ;;  %v2480_v6 = vld [vmem:[#allocation3 + $0x18] sm:$0xf]  ;;  %v2482_v7 = vld [vmem:[#allocation3 + $0x1c] sm:$0xf] }
  0x63   : > { %v2484_v8 = vld [vmem:[#allocation3 + $0x20] sm:$0xf]  ;;  %v2486_v9 = vld [vmem:[#allocation3 + $0x24] sm:$0xf]  ;;  %v2488_v10 = vld [vmem:[#allocation3 + $0x28] sm:$0xf] }
  0x64   : > { %v2490_v11 = vld [vmem:[#allocation3 + $0x2c] sm:$0xf]  ;;  %v2492_v12 = vld [vmem:[#allocation3 + $0x30] sm:$0xf]  ;;  %v2494_v13 = vld [vmem:[#allocation3 + $0x34] sm:$0xf] }
  0x65   : > { %v2496_v14 = vld [vmem:[#allocation3 + $0x38] sm:$0xf]  ;;  %v2498_v15 = vld [vmem:[#allocation3 + $0x3c] sm:$0xf]  ;;  %v2503_v16 = vld [vmem:[%s2813_s1] sm:$0xff]  ;;  %p1694_p5 = scmp.ne.s32.totalorder %s2283_s24, 0 }
  0x66   : > { %2834 = vst [vmem:[#allocation13_spill] sm:$0xff] %v2496_v14  ;;  %2835 = vst [vmem:[#allocation14_spill] sm:$0xff] %v2498_v15  ;;  %v2508_v17 = vld [vmem:[%s2813_s1 + $0x8] sm:$0xff]  ;;  %v2513_v18 = vld [vmem:[%s2813_s1 + $0x10] sm:$0xff]  ;;  %v1695_v33 = vcombine.low (!%p1694_p5), %v2468_v0, %v2470_v1  ;;  %v2298_v35 = vmov (!%p1694_p5), 0   ;;  %v1696_v54 = vcombine.low (!%p1694_p5), %v2472_v2, %v2474_v3  ;;  %v1697_v55 = vcombine.low (!%p1694_p5), %v2476_v4, %v2478_v5 }
  0x67   : > { %v2518_v19 = vld [vmem:[%s2813_s1 + $0x18] sm:$0xff]  ;;  %v2523_v20 = vld [vmem:[%s2813_s1 + $0x20] sm:$0xff]  ;;  %v2528_v21 = vld [vmem:[%s2813_s1 + $0x28] sm:$0xff]  ;;  %385 = sbr.rel (%p1694_p5) target bundleno = 632 (0x278), region = 64  ;;  %2095 = vset.pattern.permute.xlu0 (!%p1694_p5), %v2298_v35  ;;  %2096 = vset.pattern.permute.xlu1 (!%p1694_p5), %v2298_v35  ;;  %v1698_v56 = vcombine.low (!%p1694_p5), %v2480_v6, %v2482_v7  ;;  %v1699_v57 = vcombine.low (!%p1694_p5), %v2484_v8, %v2486_v9  ;;  %v1700_v58 = vcombine.low (!%p1694_p5), %v2488_v10, %v2490_v11 }
  0x68   : > { %v2533_v22 = vld [vmem:[%s2813_s1 + $0x30] sm:$0xff]  ;;  %v2538_v23 = vld [vmem:[%s2813_s1 + $0x38] sm:$0xff]  ;;  %v2543_v24 = vld [vmem:[%s2813_s1 + $0x40] sm:$0xff]  ;;  %1942 = vmatprep.mubr.bf16.mxu0 (!%p1694_p5), %v1695_v33  ;;  %637 = vperm.xlu0 (!%p1694_p5), %2095, %v2523_v20   ;;  %v1701_v59 = vcombine.low (!%p1694_p5), %v2492_v12, %v2494_v13  ;;  %v1702_v60 = vcombine.low (!%p1694_p5), %v2496_v14, %v2498_v15 }
  0x69   : > { %v2548_v25 = vld [vmem:[%s2813_s1 + $0x48] sm:$0xff]  ;;  %v2553_v26 = vld [vmem:[%s2813_s1 + $0x50] sm:$0xff]  ;;  %v2558_v27 = vld [vmem:[%s2813_s1 + $0x58] sm:$0xff]  ;;  %647 = vperm.xlu1 (!%p1694_p5), %2096, %v2533_v22  }
  0x6a   : > { %v2563_v28 = vld [vmem:[%s2813_s1 + $0x60] sm:$0xff]  ;;  %v2568_v29 = vld [vmem:[%s2813_s1 + $0x68] sm:$0xff]  ;;  %v2573_v30 = vld [vmem:[%s2813_s1 + $0x70] sm:$0xff] }
  0x6b   : > { %v2578_v31 = vld [vmem:[%s2813_s1 + $0x78] sm:$0xff]  ;;  %v2097_v32 = vld [vmem:[#allocation6] sm:$0xff] (!%p1694_p5)   ;;  %v2098_v34 = vld [vmem:[#allocation6 + $0x8] sm:$0xff] (!%p1694_p5)  }
  0x6c   : > { %1926 = vmatprep.subr.bf16.mxu0 (!%p1694_p5), %v2097_v32  ;;  %v2099_v36 = vld [vmem:[#allocation6 + $0x10] sm:$0xff] (!%p1694_p5)   ;;  %v2100_v37 = vld [vmem:[#allocation6 + $0x18] sm:$0xff] (!%p1694_p5)   ;;  %642 = vperm.xlu0 (!%p1694_p5), %2095, %v2528_v21   ;;  %v2105_v38 = vld [vmem:[%s2815_s3 + $0x40] sm:$0xff] (!%p1694_p5)  }
  0x6d   : > { %1927 = vmatpush3.bf16.msra.mxu0 (!%p1694_p5), %v2097_v32  ;;  %v2106_v39 = vld [vmem:[%s2815_s3] sm:$0xff] (!%p1694_p5)   ;;  %652 = vperm.xlu1 (!%p1694_p5), %2096, %v2538_v23   ;;  %v2107_v41 = vld [vmem:[%s2815_s3 + $0x48] sm:$0xff] (!%p1694_p5)   ;;  %v2109_v43 = vld [vmem:[%s2815_s3 + $0x50] sm:$0xff] (!%p1694_p5)  }
  0x6e   : > { %1928 = vmatprep.subr.bf16.mxu0 %v2098_v34  ;;  %v2101_v40 = vld [vmem:[#allocation6 + $0x20] sm:$0xff]   ;;  %1990 = vmatprep.subr.bf16.mxu1 %v2105_v38  ;;  %v2108_v42 = vld [vmem:[%s2815_s3 + $0x8] sm:$0xff]   ;;  %v2110_v45 = vld [vmem:[%s2815_s3 + $0x10] sm:$0xff]  }
  0x6f   : > { %1998 = vmatpush3.bf16.msra.mxu1 %v2106_v39  ;;  %v2102_v44 = vld [vmem:[#allocation6 + $0x28] sm:$0xff]   ;;  %v2111_v46 = vld [vmem:[%s2815_s3 + $0x58] sm:$0xff]   ;;  %v2103_v47 = vld [vmem:[#allocation6 + $0x30] sm:$0xff]  }
  0x70   : > { %657 = vperm.xlu0 %2095, %v2543_v24   ;;  %1991 = vmatprep.subr.bf16.mxu1 %v2107_v41  ;;  %v2112_v48 = vld [vmem:[%s2815_s3 + $0x18] sm:$0xff]   ;;  %v2113_v49 = vld [vmem:[%s2815_s3 + $0x60] sm:$0xff]   ;;  %v2115_v52 = vld [vmem:[%s2815_s3 + $0x68] sm:$0xff]  }
  0x71   : > { %1929 = vmatpush3.bf16.msra.mxu0 %v2098_v34  ;;  %662 = vperm.xlu1 %2096, %v2548_v25   ;;  %v2104_v50 = vld [vmem:[#allocation6 + $0x38] sm:$0xff]   ;;  %v2114_v51 = vld [vmem:[%s2815_s3 + $0x20] sm:$0xff]   ;;  %v2116_v53 = vld [vmem:[%s2815_s3 + $0x28] sm:$0xff]  }
  0x72   : > { %1930 = vmatprep.subr.bf16.mxu0 %v2099_v36  ;;  %v2117_v61 = vld [vmem:[%s2815_s3 + $0x70] sm:$0xff]   ;;  %v2119_v63 = vld [vmem:[%s2815_s3 + $0x78] sm:$0xff]  }
  0x73   : > { %1999 = vmatpush3.bf16.msra.mxu1 %v2108_v42  ;;  %v2118_v62 = vld [vmem:[%s2815_s3 + $0x30] sm:$0xff]   ;;  %v2120_v32 = vld [vmem:[%s2815_s3 + $0x38] sm:$0xff]  }
  0x74   : > { %667 = vperm.xlu0 %2095, %v2553_v26   ;;  %1992 = vmatprep.subr.bf16.mxu1 %v2109_v43 }
  0x75   : > { %1931 = vmatpush3.bf16.msra.mxu0 %v2099_v36  ;;  %672 = vperm.xlu1 %2096, %v2558_v27  }
  0x76   : > { %1932 = vmatprep.subr.bf16.mxu0 %v2100_v37 }
  0x77   : > { %2000 = vmatpush3.bf16.msra.mxu1 %v2110_v45 }
  0x78   : > { %617 = vperm.xlu0 %2095, %v2503_v16   ;;  %1993 = vmatprep.subr.bf16.mxu1 %v2111_v46 }
  0x79   : > { %1933 = vmatpush3.bf16.msra.mxu0 %v2100_v37  ;;  %622 = vperm.xlu1 %2096, %v2508_v17  }
  0x7a   : > { %1934 = vmatprep.subr.bf16.mxu0 %v2101_v40 }
  0x7b   : > { %2001 = vmatpush3.bf16.msra.mxu1 %v2112_v48 }
  0x7c   : > { %677 = vperm.xlu0 %2095, %v2563_v28   ;;  %1994 = vmatprep.subr.bf16.mxu1 %v2113_v49 }
  0x7d   : > { %1935 = vmatpush3.bf16.msra.mxu0 %v2101_v40  ;;  %682 = vperm.xlu1 %2096, %v2568_v29  }
  0x7e   : > { %1936 = vmatprep.subr.bf16.mxu0 %v2102_v44 }
  0x7f   : > { %2002 = vmatpush3.bf16.msra.mxu1 %v2114_v51 }
  0x80   : > { %627 = vperm.xlu0 %2095, %v2513_v18   ;;  %1995 = vmatprep.subr.bf16.mxu1 %v2115_v52 }
  0x81   : > { %1937 = vmatpush3.bf16.msra.mxu0 %v2102_v44  ;;  %632 = vperm.xlu1 %2096, %v2518_v19  }
  0x82   : > { %1938 = vmatprep.subr.bf16.mxu0 %v2103_v47 }
  0x83   : > { %2003 = vmatpush3.bf16.msra.mxu1 %v2116_v53 }
  0x84   : > { %687 = vperm.xlu0 %2095, %v2573_v30   ;;  %1996 = vmatprep.subr.bf16.mxu1 %v2117_v61 }
  0x85   : > { %1939 = vmatpush3.bf16.msra.mxu0 %v2103_v47  ;;  %692 = vperm.xlu1 %2096, %v2578_v31  }
  0x86   : > { %1940 = vmatprep.subr.bf16.mxu0 %v2104_v50 }
  0x87   : > { %2004 = vmatpush3.bf16.msra.mxu1 %v2118_v62 }
  0x88   : > { %1997 = vmatprep.subr.bf16.mxu1 %v2119_v63 }
  0x89   : > { %1941 = vmatpush3.bf16.msra.mxu0 %v2104_v50 }
  0x8a   : > { %1782 = vmatprep.subr.bf16.mxu0 %v2105_v38 }
  0x8b   : > { %2005 = vmatpush3.bf16.msra.mxu1 %v2120_v32 }
  0x8c   : > { %1943 = vmatmul.mubr.bf16.vlgmr.msra.gmra.mrb[0].mxu0 %v1696_v54 }
  0x8d   : > { %1946 = vmatprep.mubr.bf16.mxu0 %v1697_v55  ;;  %1783 = vmatpush3.bf16.msra.mxu0 %v2106_v39 }
  0x8e   : > { %1784 = vmatprep.subr.bf16.mxu0 %v2107_v41 }
  0x91   : > { %1785 = vmatpush3.bf16.msra.mxu0 %v2108_v42 }
  0x92   : > { %1786 = vmatprep.subr.bf16.mxu0 %v2109_v43 }
  0x94   : > { %1947 = vmatmul.mubr.bf16.gmra.mrb[4].mxu0 %v1698_v56  ;;  %v2121_v56 = vld [vmem:[#allocation6] sm:$0xff]  }
  0x95   : > { %1950 = vmatprep.mubr.bf16.mxu0 %v1699_v57  ;;  %1787 = vmatpush3.bf16.msra.mxu0 %v2110_v45 }
  0x96   : > { %1788 = vmatprep.subr.bf16.mxu0 %v2111_v46 }
  0x99   : > { %1789 = vmatpush3.bf16.msra.mxu0 %v2112_v48 }
  0x9a   : > { %1790 = vmatprep.subr.bf16.mxu0 %v2113_v49 }
  0x9c   : > { %1951 = vmatmul.mubr.bf16.gmra.mrb[8].mxu0 %v1700_v58 }
  0x9d   : > { %1954 = vmatprep.mubr.bf16.mxu0 %v1701_v59  ;;  %1791 = vmatpush3.bf16.msra.mxu0 %v2114_v51 }
  0x9e   : > { %1792 = vmatprep.subr.bf16.mxu0 %v2115_v52 }
  0xa1   : > { %1793 = vmatpush3.bf16.msra.mxu0 %v2116_v53 }
  0xa2   : > { %1794 = vmatprep.subr.bf16.mxu0 %v2117_v61 }
  0xa4   : > { %1955 = vmatmul.mubr.bf16.gmra.mrb[12].mxu0 %v1702_v60 }
  0xa5   : > { %1795 = vmatpush3.bf16.msra.mxu0 %v2118_v62 }
  0xa6   : > { %1796 = vmatprep.subr.bf16.mxu0 %v2119_v63 }
  0xa9   : > { %1797 = vmatpush3.bf16.msra.mxu0 %v2120_v32 }
  0xe7   : > { %v638_v33 = vpop.permute.xlu0 %637 }
  0xe8   : > { %v648_v34 = vpop.permute.xlu1 %647 }
  0xeb   : > { %v643_v35 = vpop.permute.xlu0 %642 }
  0xec   : > { %v653_v36 = vpop.permute.xlu1 %652 }
  0xef   : > { %v658_v37 = vpop.permute.xlu0 %657 }
  0xf0   : > { %v663_v38 = vpop.permute.xlu1 %662 }
  0xf3   : > { %v668_v39 = vpop.permute.xlu0 %667 }
  0xf4   : > { %v673_v40 = vpop.permute.xlu1 %672 }
  0xf7   : > { %v618_v41 = vpop.permute.xlu0 %617 }
  0xf8   : > { %v623_v42 = vpop.permute.xlu1 %622 }
  0xfb   : > { %v678_v43 = vpop.permute.xlu0 %677 }
  0xfc   : > { %v683_v44 = vpop.permute.xlu1 %682 }
  0xff   : > { %v628_v45 = vpop.permute.xlu0 %627 }
 0x100   : > { %v633_v47 = vpop.permute.xlu1 %632 }
 0x15f   : > { %v1944_v46 = vpop.f32.mrb[0].mxu0 }
 0x160   : > { %v552_v48 = vpop.f32.mrb[1].mxu0  ;;  %v697_v50 = vmul.f32 %v1944_v46, %v628_v45  ;;  %v2122_v45 = vld [vmem:[#allocation6 + $0x10] sm:$0xff]   ;;  %v2127_v46 = vld [vmem:[#allocation6 + $0x8] sm:$0xff]  }
 0x161   : > { %v1945_v49 = vpop.f32.mrb[2].mxu0  ;;  %v695_v53 = vmul.f32 %v618_v41, %v552_v48 }
 0x162   : > { %v698_v51 = vmul.f32 %v1945_v49, %v633_v47  ;;  %v555_v52 = vpop.f32.mrb[3].mxu0 }
 0x163   : > { %v696_v54 = vmul.f32 %v623_v42, %v555_v52 }
 0x164   : > { %v712_v55 = vpack.c.bf16 %v698_v51, %v697_v50 }
 0x165   : > { %v711_v57 = vpack.c.bf16 %v696_v54, %v695_v53  ;;  %v2123_v53 = vld [vmem:[#allocation6 + $0x18] sm:$0xff]   ;;  %v688_v54 = vpop.permute.xlu0 %687 }
 0x167   : > { %v1948_v58 = vpop.f32.mrb[4].mxu0  ;;  %934 = vmatprep.mubr.bf16.mxu0 %v711_v57 }
 0x168   : > { %v568_v59 = vpop.f32.mrb[5].mxu0  ;;  %935 = vmatmul.mubr.bf16.vlgmr.msra.gmra.mrb[16].mxu0 %v2121_v56  ;;  %v701_v61 = vmul.f32 %v1948_v58, %v648_v34 }
 0x169   : > { %v1949_v60 = vpop.f32.mrb[6].mxu0  ;;  %942 = vmatprep.mubr.bf16.mxu0 %v712_v55  ;;  %v699_v32 = vmul.f32 %v638_v33, %v568_v59 }
 0x16a   : > { %v702_v62 = vmul.f32 %v1949_v60, %v653_v36  ;;  %v571_v63 = vpop.f32.mrb[7].mxu0 }
 0x16b   : > { %v700_v14 = vmul.f32 %v643_v35, %v571_v63 }
 0x16c   : > { %v714_v15 = vpack.c.bf16 %v702_v62, %v701_v61  ;;  %v2128_v62 = vld [vmem:[#allocation6 + $0x38] sm:$0xff]  }
 0x16d   : > { %v713_v47 = vpack.c.bf16 %v700_v14, %v699_v32  ;;  %v693_v14 = vpop.permute.xlu1 %692 }
 0x16f   : > { %v1952_v41 = vpop.f32.mrb[8].mxu0  ;;  %950 = vmatprep.mubr.bf16.mxu1 %v713_v47 }
 0x170   : > { %v584_v42 = vpop.f32.mrb[9].mxu0  ;;  %951 = vmatmul.mubr.bf16.vlgmr.msra.gmra.mrb[0].mxu1 %v2122_v45  ;;  %943 = vmatmul.mubr.bf16.gmra.mrb[20].mxu0 %v2127_v46  ;;  %v705_v49 = vmul.f32 %v1952_v41, %v668_v39 }
 0x171   : > { %v1953_v48 = vpop.f32.mrb[10].mxu0  ;;  %958 = vmatprep.mubr.bf16.mxu1 %v714_v15  ;;  %v703_v52 = vmul.f32 %v658_v37, %v584_v42  ;;  %v2125_v37 = vld [vmem:[#allocation6 + $0x28] sm:$0xff]  }
 0x172   : > { %v706_v50 = vmul.f32 %v1953_v48, %v673_v40  ;;  %v587_v51 = vpop.f32.mrb[11].mxu0  ;;  %v2124_v40 = vld [vmem:[#allocation6 + $0x20] sm:$0xff]  }
 0x173   : > { %v704_v34 = vmul.f32 %v663_v38, %v587_v51  ;;  %v2126_v38 = vld [vmem:[#allocation6 + $0x30] sm:$0xff]  }
 0x174   : > { %v716_v36 = vpack.c.bf16 %v706_v50, %v705_v49 }
 0x175   : > { %v715_v33 = vpack.c.bf16 %v704_v34, %v703_v52 }
 0x177   : > { %v1956_v35 = vpop.f32.mrb[12].mxu0 }
 0x178   : > { %v600_v55 = vpop.f32.mrb[13].mxu0  ;;  %959 = vmatmul.mubr.bf16.gmra.mrb[4].mxu1 %v2123_v53  ;;  %v709_v57 = vmul.f32 %v1956_v35, %v688_v54 }
 0x179   : > { %v1957_v56 = vpop.f32.mrb[14].mxu0  ;;  %966 = vmatprep.mubr.bf16.mxu1 %v715_v33  ;;  %v707_v60 = vmul.f32 %v678_v43, %v600_v55  ;;  %v2664_v43 = vld [vmem:[%s2816_s4] ss:$0 sm:$0xff] }
 0x17a   : > { %v710_v58 = vmul.f32 %v1957_v56, %v693_v14  ;;  %v603_v59 = vpop.f32.mrb[15].mxu0 }
 0x17b   : > { %v708_v15 = vmul.f32 %v683_v44, %v603_v59 }
 0x17c   : > { %v718_v39 = vpack.c.bf16 %v710_v58, %v709_v57 }
 0x17d   : > { %v717_v61 = vpack.c.bf16 %v708_v15, %v707_v60 }
 0x180   : > { %967 = vmatmul.mubr.bf16.gmra.mrb[8].mxu1 %v2124_v40 }
 0x181   : > { %974 = vmatprep.mubr.bf16.mxu1 %v716_v36 }
 0x188   : > { %975 = vmatmul.mubr.bf16.gmra.mrb[12].mxu1 %v2125_v37 }
 0x189   : > { %982 = vmatprep.mubr.bf16.mxu1 %v717_v61 }
 0x190   : > { %983 = vmatmul.mubr.bf16.gmra.mrb[16].mxu1 %v2126_v38 }
 0x191   : > { %990 = vmatprep.mubr.bf16.mxu1 %v718_v39 }
 0x198   : > { %991 = vmatmul.mubr.bf16.gmra.mrb[20].mxu1 %v2128_v62 }
 0x23b   : > { %v1798_v63 = vpop.f32.mrb[16].mxu0 }
 0x23c   : > { %v1799_v32 = vpop.f32.mrb[17].mxu0 }
 0x23d   : > { %v1800_v45 = vadd.f32 %v1799_v32, %v1798_v63  ;;  %v1801_v46 = vpop.f32.mrb[18].mxu0 }
 0x23e   : > { %v1802_v44 = vpop.f32.mrb[19].mxu0 }
 0x23f   : > { %v937_v47 = vadd.f32 %v1800_v45, %v2664_v43  ;;  %v1803_v41 = vadd.f32 %v1802_v44, %v1801_v46 }
 0x241   : > { %v999_v42 = vmax.f32 %v937_v47, 0.0  ;;  %v940_v48 = vadd.f32 %v1803_v41, %v2664_v43 }
 0x243   : > { %v1810_v49 = vpop.f32.mrb[0].mxu1  ;;  %v1000_v50 = vmax.f32 %v940_v48, 0.0  ;;  %v1804_v51 = vpop.f32.mrb[20].mxu0 }
 0x244   : > { %v1811_v52 = vpop.f32.mrb[1].mxu1  ;;  %v1805_v34 = vpop.f32.mrb[21].mxu0 }
 0x245   : > { %v1812_v36 = vadd.f32 %v1811_v52, %v1810_v49  ;;  %v1813_v53 = vpop.f32.mrb[2].mxu1  ;;  %v1015_v33 = vpack.c.bf16 %v1000_v50, %v999_v42  ;;  %v1806_v35 = vadd.f32 %v1805_v34, %v1804_v51  ;;  %v1807_v54 = vpop.f32.mrb[22].mxu0 }
 0x246   : > { %v1814_v55 = vpop.f32.mrb[3].mxu1  ;;  %v1808_v14 = vpop.f32.mrb[23].mxu0 }
 0x247   : > { %v953_v56 = vadd.f32 %v1812_v36, %v2664_v43  ;;  %v1815_v57 = vadd.f32 %v1814_v55, %v1813_v53  ;;  %1027 = vst [vmem:[#allocation2] sm:$0xff] %v1015_v33  ;;  %v945_v58 = vadd.f32 %v1806_v35, %v2664_v43  ;;  %v1809_v59 = vadd.f32 %v1808_v14, %v1807_v54 }
 0x249   : > { %v956_v60 = vadd.f32 %v1815_v57, %v2664_v43  ;;  %v1001_v15 = vmax.f32 %v945_v58, 0.0  ;;  %v948_v39 = vadd.f32 %v1809_v59, %v2664_v43  ;;  %v1003_v40 = vmax.f32 %v953_v56, 0.0 }
 0x24b   : > { %v1004_v61 = vmax.f32 %v956_v60, 0.0  ;;  %v1816_v37 = vpop.f32.mrb[4].mxu1  ;;  %v1002_v38 = vmax.f32 %v948_v39, 0.0 }
 0x24c   : > { %v1817_v62 = vpop.f32.mrb[5].mxu1 }
 0x24d   : > { %v1017_v63 = vpack.c.bf16 %v1004_v61, %v1003_v40  ;;  %v1818_v32 = vadd.f32 %v1817_v62, %v1816_v37  ;;  %v1819_v45 = vpop.f32.mrb[6].mxu1  ;;  %v1016_v46 = vpack.c.bf16 %v1002_v38, %v1001_v15 }
 0x24e   : > { %v1820_v44 = vpop.f32.mrb[7].mxu1 }
 0x24f   : > { %1029 = vst [vmem:[#allocation2 + $0x10] sm:$0xff] %v1017_v63  ;;  %v961_v47 = vadd.f32 %v1818_v32, %v2664_v43  ;;  %v1821_v41 = vadd.f32 %v1820_v44, %v1819_v45  ;;  %1028 = vst [vmem:[#allocation2 + $0x8] sm:$0xff] %v1016_v46 }
 0x251   : > { %v964_v42 = vadd.f32 %v1821_v41, %v2664_v43  ;;  %v1005_v48 = vmax.f32 %v961_v47, 0.0 }
 0x253   : > { %v1006_v49 = vmax.f32 %v964_v42, 0.0  ;;  %v1822_v50 = vpop.f32.mrb[8].mxu1 }
 0x254   : > { %v1823_v51 = vpop.f32.mrb[9].mxu1 }
 0x255   : > { %v1018_v52 = vpack.c.bf16 %v1006_v49, %v1005_v48  ;;  %v1824_v34 = vadd.f32 %v1823_v51, %v1822_v50  ;;  %v1825_v36 = vpop.f32.mrb[10].mxu1 }
 0x256   : > { %v1826_v53 = vpop.f32.mrb[11].mxu1 }
 0x257   : > { %1030 = vst [vmem:[#allocation2 + $0x18] sm:$0xff] %v1018_v52  ;;  %v969_v33 = vadd.f32 %v1824_v34, %v2664_v43  ;;  %v1827_v35 = vadd.f32 %v1826_v53, %v1825_v36 }
 0x259   : > { %v972_v54 = vadd.f32 %v1827_v35, %v2664_v43  ;;  %v1007_v55 = vmax.f32 %v969_v33, 0.0 }
 0x25b   : > { %v1008_v14 = vmax.f32 %v972_v54, 0.0  ;;  %v1828_v56 = vpop.f32.mrb[12].mxu1 }
 0x25c   : > { %v1829_v57 = vpop.f32.mrb[13].mxu1 }
 0x25d   : > { %v1019_v58 = vpack.c.bf16 %v1008_v14, %v1007_v55  ;;  %v1830_v59 = vadd.f32 %v1829_v57, %v1828_v56  ;;  %v1831_v60 = vpop.f32.mrb[14].mxu1 }
 0x25e   : > { %v1832_v15 = vpop.f32.mrb[15].mxu1 }
 0x25f   : > { %1031 = vst [vmem:[#allocation2 + $0x20] sm:$0xff] %v1019_v58  ;;  %v977_v39 = vadd.f32 %v1830_v59, %v2664_v43  ;;  %v1833_v40 = vadd.f32 %v1832_v15, %v1831_v60 }
 0x261   : > { %v980_v61 = vadd.f32 %v1833_v40, %v2664_v43  ;;  %v1009_v37 = vmax.f32 %v977_v39, 0.0 }
 0x263   : > { %v1010_v38 = vmax.f32 %v980_v61, 0.0  ;;  %v1834_v62 = vpop.f32.mrb[16].mxu1 }
 0x264   : > { %v1835_v63 = vpop.f32.mrb[17].mxu1 }
 0x265   : > { %v1020_v32 = vpack.c.bf16 %v1010_v38, %v1009_v37  ;;  %v1836_v45 = vadd.f32 %v1835_v63, %v1834_v62  ;;  %v1837_v46 = vpop.f32.mrb[18].mxu1 }
 0x266   : > { %v1838_v44 = vpop.f32.mrb[19].mxu1 }
 0x267   : > { %1032 = vst [vmem:[#allocation2 + $0x28] sm:$0xff] %v1020_v32  ;;  %v985_v47 = vadd.f32 %v1836_v45, %v2664_v43  ;;  %v1839_v41 = vadd.f32 %v1838_v44, %v1837_v46 }
 0x269   : > { %v988_v42 = vadd.f32 %v1839_v41, %v2664_v43  ;;  %v1011_v48 = vmax.f32 %v985_v47, 0.0 }
 0x26b   : > { %v1012_v49 = vmax.f32 %v988_v42, 0.0  ;;  %v1840_v50 = vpop.f32.mrb[20].mxu1 }
 0x26c   : > { %v1841_v51 = vpop.f32.mrb[21].mxu1 }
 0x26d   : > { %v1021_v52 = vpack.c.bf16 %v1012_v49, %v1011_v48  ;;  %v1842_v34 = vadd.f32 %v1841_v51, %v1840_v50  ;;  %v1843_v36 = vpop.f32.mrb[22].mxu1 }
 0x26e   : > { %v1844_v53 = vpop.f32.mrb[23].mxu1 }
 0x26f   : > { %1033 = vst [vmem:[#allocation2 + $0x30] sm:$0xff] %v1021_v52  ;;  %v993_v33 = vadd.f32 %v1842_v34, %v2664_v43  ;;  %v1845_v35 = vadd.f32 %v1844_v53, %v1843_v36 }
 0x271   : > { %v996_v54 = vadd.f32 %v1845_v35, %v2664_v43  ;;  %v1013_v55 = vmax.f32 %v993_v33, 0.0 }
 0x273   : > { %v1014_v14 = vmax.f32 %v996_v54, 0.0 }
 0x275   : > { %v1022_v56 = vpack.c.bf16 %v1014_v14, %v1013_v55 }
 0x277   : > { %1034 = vst [vmem:[#allocation2 + $0x38] sm:$0xff] %v1022_v56 }
 0x278 PF: > { %p1736_p3 = scmp.ne.s32.totalorder %s2283_s24, 1 }
 0x279   : > { %v2683_v57 = vld [vmem:[#allocation2] sm:$0xff] (!%p1736_p3)  ;;  %v2685_v58 = vld [vmem:[#allocation2 + $0x8] sm:$0xff] (!%p1736_p3)  ;;  %v1737_v59 = vcombine.low (!%p1736_p3), %v2468_v0, %v2470_v1  ;;  %v2691_v43 = vld [vmem:[#allocation2 + $0x10] sm:$0xff] (!%p1736_p3)  ;;  %v2299_v60 = vmov (!%p1736_p3), 0  }
 0x27a   : > { %1038 = sbr.rel (%p1736_p3) target bundleno = 1154 (0x482), region = 68  ;;  %1958 = vmatprep.subr.bf16.mxu0 (!%p1736_p3), %v2683_v57  ;;  %2129 = vset.pattern.permute.xlu0 (!%p1736_p3), %v2299_v60  ;;  %v2131_v15 = vld [vmem:[#allocation8 + $0x40] sm:$0xff] (!%p1736_p3)   ;;  %v2697_v0 = vld [vmem:[#allocation2 + $0x18] sm:$0xff] (!%p1736_p3)  ;;  %v2133_v1 = vld [vmem:[#allocation8 + $0x48] sm:$0xff] (!%p1736_p3)  }
 0x27b   : > { %1959 = vmatpush3.bf16.msra.mxu0 (!%p1736_p3), %v2683_v57  ;;  %1974 = vmatprep.mubr.bf16.mxu0 (!%p1736_p3), %v1737_v59  ;;  %v2132_v39 = vld [vmem:[#allocation8] sm:$0xff] (!%p1736_p3)   ;;  %v2134_v40 = vld [vmem:[#allocation8 + $0x8] sm:$0xff] (!%p1736_p3)   ;;  %v2136_v61 = vld [vmem:[#allocation8 + $0x10] sm:$0xff] (!%p1736_p3)  }
 0x27c   : > { %1960 = vmatprep.subr.bf16.mxu0 (!%p1736_p3), %v2685_v58  ;;  %1226 = vperm.xlu0 (!%p1736_p3), %2129, %v2523_v20   ;;  %v2703_v20 = vld [vmem:[#allocation2 + $0x20] sm:$0xff] (!%p1736_p3)  ;;  %v2138_v37 = vld [vmem:[#allocation8 + $0x18] sm:$0xff] (!%p1736_p3)   ;;  %v2142_v62 = vld [vmem:[#allocation8 + $0x28] sm:$0xff] (!%p1736_p3)  }
 0x27d   : > { %2130 = vset.pattern.permute.xlu1 (!%p1736_p3), %v2299_v60  ;;  %2006 = vmatprep.subr.bf16.mxu1 (!%p1736_p3), %v2131_v15  ;;  %v2140_v38 = vld [vmem:[#allocation8 + $0x20] sm:$0xff] (!%p1736_p3)  }
 0x27e   : > { %1236 = vperm.xlu1 (!%p1736_p3), %2130, %v2533_v22   ;;  %2014 = vmatpush3.bf16.msra.mxu1 (!%p1736_p3), %v2132_v39  ;;  %v2135_v22 = vld [vmem:[#allocation8 + $0x50] sm:$0xff] (!%p1736_p3)  }
 0x27f   : > { %1961 = vmatpush3.bf16.msra.mxu0 (!%p1736_p3), %v2685_v58  ;;  %2007 = vmatprep.subr.bf16.mxu1 (!%p1736_p3), %v2133_v1 }
 0x280   : > { %1962 = vmatprep.subr.bf16.mxu0 (!%p1736_p3), %v2691_v43  ;;  %1231 = vperm.xlu0 (!%p1736_p3), %2129, %v2528_v21   ;;  %v2137_v21 = vld [vmem:[#allocation8 + $0x58] sm:$0xff] (!%p1736_p3)  }
 0x282   : > { %1241 = vperm.xlu1 %2130, %v2538_v23   ;;  %2015 = vmatpush3.bf16.msra.mxu1 %v2134_v40  ;;  %v2710_v23 = vld [vmem:[#allocation2 + $0x28] sm:$0xff] }
 0x283   : > { %1963 = vmatpush3.bf16.msra.mxu0 %v2691_v43  ;;  %2008 = vmatprep.subr.bf16.mxu1 %v2135_v22 }
 0x284   : > { %1964 = vmatprep.subr.bf16.mxu0 %v2697_v0  ;;  %1246 = vperm.xlu0 %2129, %v2543_v24   ;;  %v2139_v24 = vld [vmem:[#allocation8 + $0x60] sm:$0xff]  }
 0x286   : > { %1251 = vperm.xlu1 %2130, %v2548_v25   ;;  %2016 = vmatpush3.bf16.msra.mxu1 %v2136_v61  ;;  %v2716_v25 = vld [vmem:[#allocation2 + $0x30] sm:$0xff] }
 0x287   : > { %1965 = vmatpush3.bf16.msra.mxu0 %v2697_v0  ;;  %2009 = vmatprep.subr.bf16.mxu1 %v2137_v21 }
 0x288   : > { %1966 = vmatprep.subr.bf16.mxu0 %v2703_v20  ;;  %1256 = vperm.xlu0 %2129, %v2553_v26   ;;  %v2141_v26 = vld [vmem:[#allocation8 + $0x68] sm:$0xff]  }
 0x28a   : > { %1261 = vperm.xlu1 %2130, %v2558_v27   ;;  %2017 = vmatpush3.bf16.msra.mxu1 %v2138_v37  ;;  %v2722_v27 = vld [vmem:[#allocation2 + $0x38] sm:$0xff] }
 0x28b   : > { %1967 = vmatpush3.bf16.msra.mxu0 %v2703_v20  ;;  %2010 = vmatprep.subr.bf16.mxu1 %v2139_v24 }
 0x28c   : > { %1968 = vmatprep.subr.bf16.mxu0 %v2710_v23  ;;  %1206 = vperm.xlu0 %2129, %v2503_v16   ;;  %v1738_v16 = vcombine.low %v2472_v2, %v2474_v3  ;;  %v1741_v2 = vcombine.low %v2484_v8, %v2486_v9  ;;  %v1742_v3 = vcombine.low %v2488_v10, %v2490_v11  ;;  %v2143_v8 = vld [vmem:[#allocation8 + $0x70] sm:$0xff]   ;;  %v2145_v10 = vld [vmem:[#allocation8 + $0x78] sm:$0xff]  }
 0x28d   : > { %v2144_v9 = vld [vmem:[#allocation8 + $0x30] sm:$0xff]   ;;  %v2146_v11 = vld [vmem:[#allocation8 + $0x38] sm:$0xff]  }
 0x28e   : > { %1211 = vperm.xlu1 %2130, %v2508_v17   ;;  %2018 = vmatpush3.bf16.msra.mxu1 %v2140_v38  ;;  %v1739_v17 = vcombine.low %v2476_v4, %v2478_v5  ;;  %v1743_v4 = vcombine.low %v2492_v12, %v2494_v13  ;;  %v2836_v5 = vld [vmem:[#allocation14_spill] sm:$0xff] }
 0x28f   : > { %1969 = vmatpush3.bf16.msra.mxu0 %v2710_v23  ;;  %2011 = vmatprep.subr.bf16.mxu1 %v2141_v26 }
 0x290   : > { %1970 = vmatprep.subr.bf16.mxu0 %v2716_v25  ;;  %1266 = vperm.xlu0 %2129, %v2563_v28  }
 0x292   : > { %1271 = vperm.xlu1 %2130, %v2568_v29   ;;  %2019 = vmatpush3.bf16.msra.mxu1 %v2142_v62 }
 0x293   : > { %1971 = vmatpush3.bf16.msra.mxu0 %v2716_v25  ;;  %2012 = vmatprep.subr.bf16.mxu1 %v2143_v8 }
 0x294   : > { %1972 = vmatprep.subr.bf16.mxu0 %v2722_v27  ;;  %1216 = vperm.xlu0 %2129, %v2513_v18   ;;  %v1740_v18 = vcombine.low %v2480_v6, %v2482_v7  ;;  %v2837_v6 = vld [vmem:[#allocation13_spill] sm:$0xff] }
 0x295   : > { %v1744_v7 = vcombine.low %v2837_v6, %v2836_v5 }
 0x296   : > { %1221 = vperm.xlu1 %2130, %v2518_v19   ;;  %2020 = vmatpush3.bf16.msra.mxu1 %v2144_v9 }
 0x297   : > { %1973 = vmatpush3.bf16.msra.mxu0 %v2722_v27  ;;  %2013 = vmatprep.subr.bf16.mxu1 %v2145_v10 }
 0x298   : > { %1862 = vmatprep.subr.bf16.mxu0 %v2131_v15  ;;  %1276 = vperm.xlu0 %2129, %v2573_v30  }
 0x29a   : > { %1975 = vmatmul.mubr.bf16.vlgmr.msra.gmra.mrb[0].mxu0 %v1738_v16  ;;  %1281 = vperm.xlu1 %2130, %v2578_v31  }
 0x29b   : > { %1978 = vmatprep.mubr.bf16.mxu0 %v1739_v17  ;;  %1863 = vmatpush3.bf16.msra.mxu0 %v2132_v39 }
 0x29c   : > { %1864 = vmatprep.subr.bf16.mxu0 %v2133_v1  ;;  %2021 = vmatpush3.bf16.msra.mxu1 %v2146_v11 }
 0x29f   : > { %1865 = vmatpush3.bf16.msra.mxu0 %v2134_v40 }
 0x2a0   : > { %1866 = vmatprep.subr.bf16.mxu0 %v2135_v22 }
 0x2a2   : > { %1979 = vmatmul.mubr.bf16.gmra.mrb[4].mxu0 %v1740_v18 }
 0x2a3   : > { %1982 = vmatprep.mubr.bf16.mxu0 %v1741_v2  ;;  %1867 = vmatpush3.bf16.msra.mxu0 %v2136_v61 }
 0x2a4   : > { %1868 = vmatprep.subr.bf16.mxu0 %v2137_v21 }
 0x2a7   : > { %1869 = vmatpush3.bf16.msra.mxu0 %v2138_v37 }
 0x2a8   : > { %1870 = vmatprep.subr.bf16.mxu0 %v2139_v24 }
 0x2aa   : > { %1983 = vmatmul.mubr.bf16.gmra.mrb[8].mxu0 %v1742_v3 }
 0x2ab   : > { %1986 = vmatprep.mubr.bf16.mxu0 %v1743_v4  ;;  %1871 = vmatpush3.bf16.msra.mxu0 %v2140_v38 }
 0x2ac   : > { %1872 = vmatprep.subr.bf16.mxu0 %v2141_v26 }
 0x2af   : > { %1873 = vmatpush3.bf16.msra.mxu0 %v2142_v62 }
 0x2b0   : > { %1874 = vmatprep.subr.bf16.mxu0 %v2143_v8 }
 0x2b2   : > { %1987 = vmatmul.mubr.bf16.gmra.mrb[12].mxu0 %v1744_v7 }
 0x2b3   : > { %1875 = vmatpush3.bf16.msra.mxu0 %v2144_v9 }
 0x2b4   : > { %1876 = vmatprep.subr.bf16.mxu0 %v2145_v10 }
 0x2b7   : > { %1877 = vmatpush3.bf16.msra.mxu0 %v2146_v11 }
 0x2fb   : > { %v1227_v12 = vpop.permute.xlu0 %1226 }
 0x2fd   : > { %v1237_v13 = vpop.permute.xlu1 %1236 }
 0x2ff   : > { %v1232_v19 = vpop.permute.xlu0 %1231 }
 0x301   : > { %v1242_v28 = vpop.permute.xlu1 %1241 }
 0x303   : > { %v1247_v29 = vpop.permute.xlu0 %1246 }
 0x305   : > { %v1252_v30 = vpop.permute.xlu1 %1251 }
 0x307   : > { %v1257_v31 = vpop.permute.xlu0 %1256 }
 0x309   : > { %v1262_v63 = vpop.permute.xlu1 %1261 }
 0x30b   : > { %v1207_v32 = vpop.permute.xlu0 %1206 }
 0x30d   : > { %v1212_v45 = vpop.permute.xlu1 %1211 }
 0x30f   : > { %v1267_v46 = vpop.permute.xlu0 %1266 }
 0x311   : > { %v1272_v44 = vpop.permute.xlu1 %1271 }
 0x313   : > { %v1217_v47 = vpop.permute.xlu0 %1216 }
 0x315   : > { %v1222_v42 = vpop.permute.xlu1 %1221 }
 0x317   : > { %v1277_v17 = vpop.permute.xlu0 %1276 }
 0x319   : > { %v1282_v2 = vpop.permute.xlu1 %1281 }
 0x36d   : > { %v1976_v41 = vpop.f32.mrb[0].mxu0 }
 0x36e   : > { %v1141_v48 = vpop.f32.mrb[1].mxu0  ;;  %v1286_v50 = vmul.f32 %v1976_v41, %v1217_v47 }
 0x36f   : > { %v1977_v49 = vpop.f32.mrb[2].mxu0  ;;  %v1284_v34 = vmul.f32 %v1207_v32, %v1141_v48 }
 0x370   : > { %v1287_v51 = vmul.f32 %v1977_v49, %v1222_v42  ;;  %v1144_v52 = vpop.f32.mrb[3].mxu0 }
 0x371   : > { %v1285_v36 = vmul.f32 %v1212_v45, %v1144_v52 }
 0x372   : > { %v1301_v53 = vpack.c.bf16 %v1287_v51, %v1286_v50 }
 0x373   : > { %v1300_v33 = vpack.c.bf16 %v1285_v36, %v1284_v34 }
 0x375   : > { %v1980_v35 = vpop.f32.mrb[4].mxu0  ;;  %1475 = vmatprep.mubr.bf16.mxu0 %v1300_v33 }
 0x376   : > { %v1157_v54 = vpop.f32.mrb[5].mxu0  ;;  %1476 = vmatmul.mubr.bf16.vlgmr.msra.gmra.mrb[16].mxu0 %v2683_v57  ;;  %v1290_v14 = vmul.f32 %v1980_v35, %v1237_v13 }
 0x377   : > { %v1981_v55 = vpop.f32.mrb[6].mxu0  ;;  %1483 = vmatprep.mubr.bf16.mxu0 %v1301_v53  ;;  %v1288_v60 = vmul.f32 %v1227_v12, %v1157_v54  ;;  %v2758_v12 = vld [vmem:[%s2818_s6] ss:$0 sm:$0xff] }
 0x378   : > { %v1291_v56 = vmul.f32 %v1981_v55, %v1242_v28  ;;  %v1160_v59 = vpop.f32.mrb[7].mxu0 }
 0x379   : > { %v1289_v15 = vmul.f32 %v1232_v19, %v1160_v59 }
 0x37a   : > { %v1303_v39 = vpack.c.bf16 %v1291_v56, %v1290_v14 }
 0x37b   : > { %v1302_v1 = vpack.c.bf16 %v1289_v15, %v1288_v60 }
 0x37d   : > { %v1984_v40 = vpop.f32.mrb[8].mxu0  ;;  %1491 = vmatprep.mubr.bf16.mxu1 %v1302_v1 }
 0x37e   : > { %v1173_v22 = vpop.f32.mrb[9].mxu0  ;;  %1492 = vmatmul.mubr.bf16.vlgmr.msra.gmra.mrb[0].mxu1 %v2691_v43  ;;  %1484 = vmatmul.mubr.bf16.gmra.mrb[20].mxu0 %v2685_v58  ;;  %v1294_v21 = vmul.f32 %v1984_v40, %v1257_v31 }
 0x37f   : > { %v1985_v61 = vpop.f32.mrb[10].mxu0  ;;  %1499 = vmatprep.mubr.bf16.mxu1 %v1303_v39  ;;  %v1292_v24 = vmul.f32 %v1247_v29, %v1173_v22 }
 0x380   : > { %v1295_v57 = vmul.f32 %v1985_v61, %v1262_v63  ;;  %v1176_v37 = vpop.f32.mrb[11].mxu0 }
 0x381   : > { %v1293_v38 = vmul.f32 %v1252_v30, %v1176_v37 }
 0x382   : > { %v1305_v26 = vpack.c.bf16 %v1295_v57, %v1294_v21 }
 0x383   : > { %v1304_v62 = vpack.c.bf16 %v1293_v38, %v1292_v24 }
 0x385   : > { %v1988_v16 = vpop.f32.mrb[12].mxu0 }
 0x386   : > { %v1189_v18 = vpop.f32.mrb[13].mxu0  ;;  %1500 = vmatmul.mubr.bf16.gmra.mrb[4].mxu1 %v2697_v0  ;;  %v1298_v43 = vmul.f32 %v1988_v16, %v1277_v17 }
 0x387   : > { %v1989_v3 = vpop.f32.mrb[14].mxu0  ;;  %1507 = vmatprep.mubr.bf16.mxu1 %v1304_v62  ;;  %v1296_v5 = vmul.f32 %v1267_v46, %v1189_v18 }
 0x388   : > { %v1299_v4 = vmul.f32 %v1989_v3, %v1282_v2  ;;  %v1192_v58 = vpop.f32.mrb[15].mxu0 }
 0x389   : > { %v1297_v6 = vmul.f32 %v1272_v44, %v1192_v58 }
 0x38a   : > { %v1307_v7 = vpack.c.bf16 %v1299_v4, %v1298_v43 }
 0x38b   : > { %v1306_v8 = vpack.c.bf16 %v1297_v6, %v1296_v5 }
 0x38e   : > { %1508 = vmatmul.mubr.bf16.gmra.mrb[8].mxu1 %v2703_v20 }
 0x38f   : > { %1515 = vmatprep.mubr.bf16.mxu1 %v1305_v26 }
 0x396   : > { %1516 = vmatmul.mubr.bf16.gmra.mrb[12].mxu1 %v2710_v23 }
 0x397   : > { %1523 = vmatprep.mubr.bf16.mxu1 %v1306_v8 }
 0x39e   : > { %1524 = vmatmul.mubr.bf16.gmra.mrb[16].mxu1 %v2716_v25 }
 0x39f   : > { %1531 = vmatprep.mubr.bf16.mxu1 %v1307_v7 }
 0x3a6   : > { %1532 = vmatmul.mubr.bf16.gmra.mrb[20].mxu1 %v2722_v27 }
 0x449   : > { %v1878_v0 = vpop.f32.mrb[16].mxu0 }
 0x44a   : > { %v1879_v9 = vpop.f32.mrb[17].mxu0 }
 0x44b   : > { %v1880_v10 = vadd.f32 %v1879_v9, %v1878_v0  ;;  %v1881_v11 = vpop.f32.mrb[18].mxu0 }
 0x44c   : > { %v1882_v13 = vpop.f32.mrb[19].mxu0 }
 0x44d   : > { %v1478_v20 = vadd.f32 %v1880_v10, %v2758_v12  ;;  %v1883_v19 = vadd.f32 %v1882_v13, %v1881_v11 }
 0x44f   : > { %1540 = vst [vmem:[#allocation9] sm:$0xff] %v1478_v20  ;;  %v1481_v23 = vadd.f32 %v1883_v19, %v2758_v12 }
 0x451   : > { %v1890_v25 = vpop.f32.mrb[0].mxu1  ;;  %1541 = vst [vmem:[#allocation9 + $0x8] sm:$0xff] %v1481_v23  ;;  %v1884_v28 = vpop.f32.mrb[20].mxu0 }
 0x452   : > { %v1891_v27 = vpop.f32.mrb[1].mxu1  ;;  %v1885_v29 = vpop.f32.mrb[21].mxu0 }
 0x453   : > { %v1892_v30 = vadd.f32 %v1891_v27, %v1890_v25  ;;  %v1893_v31 = vpop.f32.mrb[2].mxu1  ;;  %v1886_v63 = vadd.f32 %v1885_v29, %v1884_v28  ;;  %v1887_v32 = vpop.f32.mrb[22].mxu0 }
 0x454   : > { %v1894_v45 = vpop.f32.mrb[3].mxu1  ;;  %v1888_v46 = vpop.f32.mrb[23].mxu0 }
 0x455   : > { %v1494_v44 = vadd.f32 %v1892_v30, %v2758_v12  ;;  %v1895_v47 = vadd.f32 %v1894_v45, %v1893_v31  ;;  %v1486_v41 = vadd.f32 %v1886_v63, %v2758_v12  ;;  %v1889_v42 = vadd.f32 %v1888_v46, %v1887_v32 }
 0x457   : > { %1544 = vst [vmem:[#allocation9 + $0x20] sm:$0xff] %v1494_v44  ;;  %v1497_v48 = vadd.f32 %v1895_v47, %v2758_v12  ;;  %1542 = vst [vmem:[#allocation9 + $0x10] sm:$0xff] %v1486_v41  ;;  %v1489_v49 = vadd.f32 %v1889_v42, %v2758_v12 }
 0x459   : > { %1545 = vst [vmem:[#allocation9 + $0x28] sm:$0xff] %v1497_v48  ;;  %v1896_v50 = vpop.f32.mrb[4].mxu1  ;;  %1543 = vst [vmem:[#allocation9 + $0x18] sm:$0xff] %v1489_v49 }
 0x45a   : > { %v1897_v51 = vpop.f32.mrb[5].mxu1 }
 0x45b   : > { %v1898_v52 = vadd.f32 %v1897_v51, %v1896_v50  ;;  %v1899_v34 = vpop.f32.mrb[6].mxu1 }
 0x45c   : > { %v1900_v36 = vpop.f32.mrb[7].mxu1 }
 0x45d   : > { %v1502_v53 = vadd.f32 %v1898_v52, %v2758_v12  ;;  %v1901_v33 = vadd.f32 %v1900_v36, %v1899_v34 }
 0x45f   : > { %1546 = vst [vmem:[#allocation9 + $0x30] sm:$0xff] %v1502_v53  ;;  %v1505_v35 = vadd.f32 %v1901_v33, %v2758_v12 }
 0x461   : > { %1547 = vst [vmem:[#allocation9 + $0x38] sm:$0xff] %v1505_v35  ;;  %v1902_v54 = vpop.f32.mrb[8].mxu1 }
 0x462   : > { %v1903_v55 = vpop.f32.mrb[9].mxu1 }
 0x463   : > { %v1904_v14 = vadd.f32 %v1903_v55, %v1902_v54  ;;  %v1905_v56 = vpop.f32.mrb[10].mxu1 }
 0x464   : > { %v1906_v59 = vpop.f32.mrb[11].mxu1 }
 0x465   : > { %v1510_v60 = vadd.f32 %v1904_v14, %v2758_v12  ;;  %v1907_v15 = vadd.f32 %v1906_v59, %v1905_v56 }
 0x467   : > { %1548 = vst [vmem:[#allocation9 + $0x40] sm:$0xff] %v1510_v60  ;;  %v1513_v39 = vadd.f32 %v1907_v15, %v2758_v12 }
 0x469   : > { %1549 = vst [vmem:[#allocation9 + $0x48] sm:$0xff] %v1513_v39  ;;  %v1908_v1 = vpop.f32.mrb[12].mxu1 }
 0x46a   : > { %v1909_v40 = vpop.f32.mrb[13].mxu1 }
 0x46b   : > { %v1910_v22 = vadd.f32 %v1909_v40, %v1908_v1  ;;  %v1911_v61 = vpop.f32.mrb[14].mxu1 }
 0x46c   : > { %v1912_v21 = vpop.f32.mrb[15].mxu1 }
 0x46d   : > { %v1518_v57 = vadd.f32 %v1910_v22, %v2758_v12  ;;  %v1913_v37 = vadd.f32 %v1912_v21, %v1911_v61 }
 0x46f   : > { %1550 = vst [vmem:[#allocation9 + $0x50] sm:$0xff] %v1518_v57  ;;  %v1521_v24 = vadd.f32 %v1913_v37, %v2758_v12 }
 0x471   : > { %1551 = vst [vmem:[#allocation9 + $0x58] sm:$0xff] %v1521_v24  ;;  %v1914_v38 = vpop.f32.mrb[16].mxu1 }
 0x472   : > { %v1915_v26 = vpop.f32.mrb[17].mxu1 }
 0x473   : > { %v1916_v62 = vadd.f32 %v1915_v26, %v1914_v38  ;;  %v1917_v16 = vpop.f32.mrb[18].mxu1 }
 0x474   : > { %v1918_v17 = vpop.f32.mrb[19].mxu1 }
 0x475   : > { %v1526_v18 = vadd.f32 %v1916_v62, %v2758_v12  ;;  %v1919_v2 = vadd.f32 %v1918_v17, %v1917_v16 }
 0x477   : > { %1552 = vst [vmem:[#allocation9 + $0x60] sm:$0xff] %v1526_v18  ;;  %v1529_v3 = vadd.f32 %v1919_v2, %v2758_v12 }
 0x479   : > { %1553 = vst [vmem:[#allocation9 + $0x68] sm:$0xff] %v1529_v3  ;;  %v1920_v43 = vpop.f32.mrb[20].mxu1 }
 0x47a   : > { %v1921_v4 = vpop.f32.mrb[21].mxu1 }
 0x47b   : > { %v1922_v58 = vadd.f32 %v1921_v4, %v1920_v43  ;;  %v1923_v5 = vpop.f32.mrb[22].mxu1 }
 0x47c   : > { %v1924_v6 = vpop.f32.mrb[23].mxu1 }
 0x47d   : > { %v1534_v7 = vadd.f32 %v1922_v58, %v2758_v12  ;;  %v1925_v8 = vadd.f32 %v1924_v6, %v1923_v5 }
 0x47f   : > { %1554 = vst [vmem:[#allocation9 + $0x70] sm:$0xff] %v1534_v7  ;;  %v1537_v0 = vadd.f32 %v1925_v8, %v2758_v12 }
 0x481   : > { %1555 = vst [vmem:[#allocation9 + $0x78] sm:$0xff] %v1537_v0 }
 0x482 PF: > { %s2838_s14 = sadd.s32 4294967295, %s2291_s26   ;;  %s2300_s19 = smov [#allocation9]  }
 0x483   : > { %p2778_p6 = scmp.eq.s32.totalorder %s2838_s14, 1  ;;  %s1571_s20 = sshll.u32 %s2300_s19, 4  ;;  %s1572_s20 = int_to_ptr.vmem [resolvable:$true] %s1571_s20 }
 0x484   : > { %s2231_s21 = scalar_lea.vmem %s1572_s20, 2048  ;;  %s2237_s9 = scalar_lea.vmem %s1572_s20, 4096 }
 0x485   : > { %p2232_p9 = scmp.ne.s32.totalorder %s1572_s20, %s2231_s21  ;;  %p2238_p12 = scmp.lt.s32.totalorder %s1572_s20, %s1572_s20 }
 0x486   : > { %p2239_p13 = scmp.lt.s32.totalorder %s2237_s9, %s2231_s21 }
 0x487   : > { %p2233_p10 = pnand %p2232_p9, %p2778_p6 }
 0x488   : > { %p2240_p0 = por %p2239_p13, %p2238_p12 }
 0x489   : > { %p2234_p11 = pneg %p2233_p10 }
 0x48b   : > { %p2241_p1 = pnand %p2240_p0, %p2234_p11 }
 0x48d   : > { %2244 = shalt.err (!%p2241_p1)
}
 0x48e   : > { %s2245_s8 = scalar_lea.hbm %s2819_s7, 2048 }
 0x48f   : > { %p2246_p4 = scmp.ne.s32.totalorder %s2819_s7, %s2245_s8  ;;  %p2251_p8 = scmp.lt.u32.totalorder %s2245_s8, %s2819_s7 }
 0x491   : > { %p2247_p7 = pnand %p2246_p4, %p2778_p6 }
 0x493   : > { %p2248_p2 = pneg %p2247_p7 }
 0x495   : > { %p2253_p5 = pnand %p2251_p8, %p2248_p2 }
 0x497   : > { %2256 = shalt.err (!%p2253_p5)
}
 0x498   : > { %s2301_s22 = smov 128   ;;  %s2302_s23 = smov 8  }
 0x499   : > { %2035 = dma.vmem_to_hbm [thread:$0]  (%p2778_p6), %s1572_s20, 2048, %s2819_s7, [#allocation5], %s2301_s22, %s2301_s22, %s2302_s23  }
 0x49a PF: > { %p2059_p3 = scmp.ge.s32.totalorder %s2291_s26, 2  ;;  %s2840_s28 = sadd.s32 4294967294, %s2291_s26  }
 0x49b   : > { %p2060_p9 = scmp.eq.s32.totalorder %s2840_s28, 1 }
 0x49d   : > { %p2049_p10 = pnand %p2060_p9, %p2059_p3 }
 0x49f   : > { %2278 = dma.done.wait (!%p2049_p10), [#allocation5], 2048  }
 0x4a0   : > { %2280 = vsyncadd (!%p2049_p10), [#allocation5], 4294965248  ;;  %s22_s26 = sadd.s32 1, %s2291_s26   ;;  %s2841_s24 = smov %s2287_s25 }
 0x4a1   : > { %p19_p11 = scmp.ge.s32.totalorder %s22_s26, 4   ;;  %s2842_s25 = smov %s2844_s11 }
 0x4a3   :  { %21 = sbr.rel (!%p19_p11) target bundleno = 5 (0x5), region = 108 }
 0x4aa   :  { %1592 = vsyncpa [#allocation4], 1 }
 0x4ab   :  { %1594 = vsyncpa [#allocation4 + $0x1], 1 }
 0x4ac   :  { %1595 = vsyncpa [#allocation7], 1 }
 0x4ad   :  { %1596 = vsyncpa [#allocation5], 1 }
 0x4ae   :  { %1598 = vsyncpa [#allocation5 + $0x1], 1 }

</bundles_post_ra>
